<compile_context>
chip_gen: v7x
topology: tpu7x:2x2x1
jax: 0.10.0
libtpu: 0.0.40
codegen_flags: <defaults>
</compile_context>

<pallas_src>
import functools

import jax
import jax.numpy as jnp
from jax.experimental import pallas as pl
from jax.experimental.pallas import tpu as pltpu


def _cdiv(a, b):
    return -(-a // b)


def _l1_loss_kernel(pred_ref, label_ref, inv_ref, out_ref, *,
                    batch_size, block_rows):
    """One grid step = `block_rows` sentences, flattened to (block_rows, S*S).

    Grid is (num_tiles,) ("arbitrary" reduction axis). The single (8, 128)
    output block is resident across the whole grid and acts as the accumulator.
    """
    t = pl.program_id(0)

    @pl.when(t == 0)
    def _init():
        out_ref[...] = jnp.zeros_like(out_ref)

    pred = pred_ref[...].astype(jnp.float32)      # (block_rows, S*S)
    label = label_ref[...].astype(jnp.float32)    # (block_rows, S*S)
    inv = inv_ref[...]                            # (block_rows, 1) f32 = 1/len^2

    # Elementwise masked |diff|; masked entries contribute 0 (select, so NaNs
    # in stale/ragged rows of the tile are never selected into the sum path).
    abs_diff = jnp.where(label != -1.0, jnp.abs(pred - label), 0.0)

    # Per-row reduction first, then a single multiply by 1/len^2 per row
    # (saves one VPU multiply per element and the (bt,1)->(bt,K) broadcast).
    row_sums = jnp.sum(abs_diff, axis=1, keepdims=True)       # (block_rows, 1)

    # Rows past the real batch (ragged last tile) are discarded with one
    # row-level select; this also kills any NaN produced from stale VMEM data.
    first_row = t * block_rows
    row_ids = first_row + jax.lax.broadcasted_iota(jnp.int32, (block_rows, 1), 0)
    row_valid = row_ids < batch_size                           # (block_rows, 1)
    contrib = jnp.where(row_valid, row_sums * inv, 0.0)        # (block_rows, 1)

    # Scalar partial sum, broadcast-accumulated over the whole output block.
    out_ref[...] += jnp.sum(contrib)


def l1_distance_loss(predictions, label_batch, length_batch, *,
                     block_rows=None, target_step_bytes=16 * 1024 * 1024):
    """Pallas-TPU forward of L1DistanceLoss. Returns (batch_loss, total_sents)."""
    B, S, S2 = predictions.shape
    assert S == S2 and label_batch.shape == (B, S, S)
    K = S * S

    # Free contiguous reshapes; native dtypes kept in HBM (kernel upcasts to
    # f32; bf16-native math on v6e/v7x is a possible further win, skipped for
    # portability to v5e and exact-f32 numerics).
    pred2 = predictions.reshape(B, K)
    label2 = label_batch.reshape(B, K)

    lengths_f = length_batch.astype(jnp.float32)
    # 1/len^2 precomputed once (inf where len == 0, matching the torch divide).
    inv_len_sq = (1.0 / (lengths_f * lengths_f)).reshape(B, 1)

    pred_isz = jnp.dtype(predictions.dtype).itemsize
    label_isz = jnp.dtype(label_batch.dtype).itemsize
    row_hbm_bytes = K * (pred_isz + label_isz)

    # f32 upcast temporaries the kernel may materialize for non-f32 inputs.
    row_work_bytes = (K * 4 if predictions.dtype != jnp.float32 else 0) + \
                     (K * 4 if label_batch.dtype != jnp.float32 else 0)

    # Physical VMEM cap (v7x is only 64 MiB/TC; v5e/v6e have 128 MiB).
    try:
        vmem_phys = int(pltpu.get_tpu_info().vmem_capacity_bytes)
    except Exception:  # pragma: no cover - conservative fallback
        vmem_phys = 64 * 1024 * 1024
    vmem_budget = vmem_phys - (8 << 20)   # headroom for compiler scratch

    def vmem_need(rows):
        # Double-buffered inputs (pred + label + lane-padded (rows,1) inv)
        # plus f32 upcast temporaries for the live tile.
        per_step = rows * (row_hbm_bytes + 128 * 4)
        return 2 * per_step + rows * row_work_bytes

    # Batch tile: ~target_step_bytes of input DMA per grid step, shrunk to fit
    # physical VMEM, and either a multiple of 8 (sublane rule) or the full batch.
    if block_rows is None:
        bt = target_step_bytes // max(row_hbm_bytes, 1)
    else:
        bt = int(block_rows)
    bt = max(1, min(bt, B, 8192))
    while bt > 8 and vmem_need(bt) > vmem_budget:
        bt //= 2
    if bt < B:
        bt = min(max(8, (bt // 8) * 8), B)

    num_tiles = _cdiv(B, bt)
    vmem_limit = int(min(vmem_phys, max(32 << 20, vmem_need(bt) + (8 << 20))))

    kernel = functools.partial(_l1_loss_kernel, batch_size=B, block_rows=bt)

    partials = pl.pallas_call(
        kernel,
        out_shape=jax.ShapeDtypeStruct((8, 128), jnp.float32),
        grid_spec=pltpu.PrefetchScalarGridSpec(
            num_scalar_prefetch=0,
            grid=(num_tiles,),
            in_specs=[
                pl.BlockSpec((bt, K), lambda t: (t, 0)),
                pl.BlockSpec((bt, K), lambda t: (t, 0)),
                pl.BlockSpec((bt, 1), lambda t: (t, 0)),
            ],
            out_specs=pl.BlockSpec((8, 128), lambda t: (0, 0)),
        ),
        compiler_params=pltpu.CompilerParams(
            dimension_semantics=("arbitrary",),
            vmem_limit_bytes=vmem_limit,
        ),
        cost_estimate=pl.CostEstimate(
            flops=5 * B * K,
            transcendentals=0,
            bytes_accessed=(pred2.size * pred_isz
                            + label2.size * label_isz + B * 4),
        ),
    )(pred2, label2, inv_len_sq)

    loss_sum = partials[0, 0]
    total_sents = jnp.sum(length_batch != 0).astype(jnp.float32)
    batch_loss = jnp.where(total_sents > 0, loss_sum / total_sents,
                           jnp.float32(0.0))
    return batch_loss, total_sents


def _reference(predictions, label_batch, length_batch):
    """Pure-JAX mirror of the PyTorch forward, for sanity checking."""
    labels_1s = (label_batch != -1).astype(jnp.float32)
    pm = predictions * labels_1s
    lm = label_batch * labels_1s
    total_sents = jnp.sum(length_batch != 0).astype(jnp.float32)
    sq = (length_batch.astype(jnp.float32)) ** 2
    loss_per_sent = jnp.sum(jnp.abs(pm - lm), axis=(1, 2))
    batch_loss = jnp.where(
        total_sents > 0, jnp.sum(loss_per_sent / sq) / total_sents, 0.0)
    return batch_loss, total_sents


def _make_inputs(key, B, S):
    k1, k2, k3 = jax.random.split(key, 3)
    predictions = jax.random.uniform(k1, (B, S, S), dtype=jnp.float32) * 5.0
    label_full = jax.random.uniform(k2, (B, S, S), dtype=jnp.float32) * 5.0
    length_batch = jax.random.randint(k3, (B,), 1, S + 1).astype(jnp.int32)
    idx = jnp.arange(S)
    valid = (idx[None, :, None] < length_batch[:, None, None]) & (
        idx[None, None, :] < length_batch[:, None, None])
    label_batch = jnp.where(valid, label_full, jnp.float32(-1.0))
    return predictions, label_batch, length_batch


def _check(pred, label, lens, **kw):
    got_loss, got_sents = l1_distance_loss(pred, label, lens, **kw)
    jax.block_until_ready((got_loss, got_sents))
    ref_loss, ref_sents = _reference(pred, label, lens)
    assert jnp.allclose(got_loss, ref_loss, rtol=1e-5, atol=1e-5), (got_loss, ref_loss)
    assert float(got_sents) == float(ref_sents), (got_sents, ref_sents)


if __name__ == "__main__":
    key = jax.random.PRNGKey(0)
    k0, k1, k2 = jax.random.split(key, 3)

    # Case 1: small batch, single tile (bt == B, no ragged rows).
    p, l, n = _make_inputs(k0, B=2, S=8)
    _check(p, l, n)

    # Case 2: forced small batch tile -> ragged last tile (row_valid path).
    p, l, n = _make_inputs(k1, B=11, S=8)
    _check(p, l, n, block_rows=8)

    # Case 3: larger S, odd number of batch tiles with a ragged last tile.
    p, l, n = _make_inputs(k2, B=20, S=16)
    _check(p, l, n, block_rows=8)

    print("KERNEL_OK")
</pallas_src>

<mosaic_0001>
module attributes {stable_mosaic.version = 11 : i64} {
  func.func @_l1_loss_kernel(%arg0: i32, %arg1: memref<2x64xf32, #tpu.memory_space<vmem>>, %arg2: memref<2x64xf32, #tpu.memory_space<vmem>>, %arg3: memref<2x1xf32, #tpu.memory_space<vmem>>, %arg4: memref<8x128xf32, #tpu.memory_space<vmem>>) attributes {dimension_semantics = [#tpu.dimension_semantics<arbitrary>], iteration_bounds = array<i64: 1>, scalar_prefetch = 0 : i64, scratch_operands = 0 : i64, tpu.core_type = #tpu.core_type<tc>, window_params = [{transform_indices = @transform_0, window_bounds = array<i64: 2, 64>}, {transform_indices = @transform_1, window_bounds = array<i64: 2, 64>}, {transform_indices = @transform_2, window_bounds = array<i64: 2, 1>}, {pipeline_mode = #tpu.pipeline_mode<synchronous>, transform_indices = @transform_3, window_bounds = array<i64: 8, 128>}]} {
    %c0_i32 = arith.constant 0 : i32
    %0 = arith.cmpi eq, %arg0, %c0_i32 : i32
    %1 = arith.extui %0 : i1 to i32
    %c0_i32_0 = arith.constant 0 : i32
    %2 = arith.cmpi ne, %1, %c0_i32_0 : i32
    scf.if %2 {
      %cst_15 = arith.constant 0.000000e+00 : f32
      %31 = vector.broadcast %cst_15 : f32 to vector<8x128xf32>
      %c0_16 = arith.constant 0 : index
      %c0_17 = arith.constant 0 : index
      %32 = vector.load %arg4[%c0_16, %c0_17] : memref<8x128xf32, #tpu.memory_space<vmem>>, vector<8x128xf32>
      tpu.vector_store %arg4[%c0_16, %c0_17], %31 {strides = array<i32>} : memref<8x128xf32, #tpu.memory_space<vmem>>, vector<8x128xf32>,
    } else {
    }
    %c0 = arith.constant 0 : index
    %c0_1 = arith.constant 0 : index
    %3 = vector.load %arg1[%c0, %c0_1] : memref<2x64xf32, #tpu.memory_space<vmem>>, vector<2x64xf32>
    %c0_2 = arith.constant 0 : index
    %c0_3 = arith.constant 0 : index
    %4 = vector.load %arg2[%c0_2, %c0_3] : memref<2x64xf32, #tpu.memory_space<vmem>>, vector<2x64xf32>
    %c0_4 = arith.constant 0 : index
    %c0_5 = arith.constant 0 : index
    %5 = vector.load %arg3[%c0_4, %c0_5] : memref<2x1xf32, #tpu.memory_space<vmem>>, vector<2x1xf32>
    %cst = arith.constant -1.000000e+00 : f32
    %6 = vector.broadcast %cst : f32 to vector<2x64xf32>
    %7 = arith.cmpf one, %4, %6 : vector<2x64xf32>
    %8 = arith.subf %3, %4 : vector<2x64xf32>
    %9 = math.absf %8 : vector<2x64xf32>
    %cst_6 = arith.constant 0.000000e+00 : f32
    %10 = vector.broadcast %cst_6 : f32 to vector<2x64xf32>
    %11 = arith.select %7, %9, %10 : vector<2x64xi1>, vector<2x64xf32>
    %cst_7 = arith.constant dense<0.000000e+00> : vector<2xf32>
    %12 = vector.multi_reduction <add>, %11, %cst_7 [1] : vector<2x64xf32> to vector<2xf32>
    %13 = vector.shape_cast %12 : vector<2xf32> to vector<2x1xf32>
    %c2_i32 = arith.constant 2 : i32
    %14 = arith.muli %arg0, %c2_i32 : i32
    %15 = tpu.iota {dimensions = array<i32: 0>} : vector<2x1xi32>
    %16 = vector.broadcast %14 : i32 to vector<2x1xi32>
    %17 = arith.addi %16, %15 : vector<2x1xi32>
    %c2_i32_8 = arith.constant 2 : i32
    %18 = vector.broadcast %c2_i32_8 : i32 to vector<2x1xi32>
    %19 = arith.cmpi slt, %17, %18 : vector<2x1xi32>
    %20 = arith.mulf %13, %5 : vector<2x1xf32>
    %cst_9 = arith.constant 0.000000e+00 : f32
    %21 = vector.broadcast %cst_9 : f32 to vector<2x1xf32>
    %22 = arith.select %19, %20, %21 : vector<2x1xi1>, vector<2x1xf32>
    %c0_10 = arith.constant 0 : index
    %c0_11 = arith.constant 0 : index
    %23 = vector.load %arg4[%c0_10, %c0_11] : memref<8x128xf32, #tpu.memory_space<vmem>>, vector<8x128xf32>
    %24 = vector.shape_cast %22 : vector<2x1xf32> to vector<1x2x1xf32>
    %cst_12 = arith.constant dense<0.000000e+00> : vector<1xf32>
    %25 = vector.multi_reduction <add>, %24, %cst_12 [1, 2] : vector<1x2x1xf32> to vector<1xf32>
    %26 = vector.shape_cast %25 : vector<1xf32> to vector<1x1x1xf32>
    %27 = vector.extract %26[0, 0, 0] : f32 from vector<1x1x1xf32>
    %28 = vector.broadcast %27 : f32 to vector<8x128xf32>
    %29 = arith.addf %23, %28 : vector<8x128xf32>
    %c0_13 = arith.constant 0 : index
    %c0_14 = arith.constant 0 : index
    %30 = vector.load %arg4[%c0_13, %c0_14] : memref<8x128xf32, #tpu.memory_space<vmem>>, vector<8x128xf32>
    tpu.vector_store %arg4[%c0_13, %c0_14], %29 {strides = array<i32>} : memref<8x128xf32, #tpu.memory_space<vmem>>, vector<8x128xf32>,
    return
  }
  func.func @transform_0(%arg0: i32) -> (i32, i32) {
    %c0_i32 = arith.constant 0 : i32
    %c0_i32_0 = arith.constant 0 : i32
    return %arg0, %c0_i32 : i32, i32
  }
  func.func @transform_1(%arg0: i32) -> (i32, i32) {
    %c0_i32 = arith.constant 0 : i32
    %c0_i32_0 = arith.constant 0 : i32
    return %arg0, %c0_i32 : i32, i32
  }
  func.func @transform_2(%arg0: i32) -> (i32, i32) {
    %c0_i32 = arith.constant 0 : i32
    %c0_i32_0 = arith.constant 0 : i32
    return %arg0, %c0_i32 : i32, i32
  }
  func.func @transform_3(%arg0: i32) -> (i32, i32) {
    %c0_i32 = arith.constant 0 : i32
    %c0_i32_0 = arith.constant 0 : i32
    %c0_i32_1 = arith.constant 0 : i32
    return %c0_i32, %c0_i32_0 : i32, i32
  }
}

</mosaic_0001>

<bundles_post_ra>
// kernel: tpu_custom_call.1
= control target key start
LH: loop header
LB: loop body
LE: loop exit
PB: predicated region body
PF: predicated region fallthrough
CT: control target
= control target key end

     0   :  { %s138_s0 = inlined_call_operand.vmem [shape: f32[2,64], index: 0, kind: input, shape index: {}]   ;;  %s139_s1 = inlined_call_operand.vmem [shape: f32[2,64], index: 1, kind: input, shape index: {}]   ;;  %s140_s2 = inlined_call_operand.vmem [shape: f32[2,1], index: 2, kind: input, shape index: {}]   ;;  %s141_s3 = inlined_call_operand.hbm [shape: f32[8,128], index: 3, kind: output, shape index: {}]  }
   0x1   :  { %v20_v0 = vld [vmem:[%s138_s0] sm:$0x3] }
   0x2   :  { %v21_v1 = vld [vmem:[%s139_s1] sm:$0x3] }
   0x3   :  { %v24_v2 = vsub.f32 %v20_v0, %v21_v1 }
   0x4   :  { %8 = vsyncpa [#allocation3], 0  ;;  %vm23_vm0 = vcmp.ne.f32.partialorder %v21_v1, -1.0  ;;  %vm27_vm1 = vcmask 517120   ;;  %v32_v6 = vlaneseq  ;;  %v22_v8 = vld [vmem:[%s140_s2] sm:$0x3] }
   0x5   :  { %v25_v3 = vand.u32 2147483647, %v24_v2  ;;  %vm40_vm3 = vcmask 1024   ;;  %s96_s0 = smov [#allocation2]  }
   0x6   :  { %v33_v7 = vshrl.u32 %v32_v6, 7  ;;  %s60_s1 = sshll.u32 %s96_s0, 4  ;;  %s61_s1 = int_to_ptr.vmem [resolvable:$true] %s60_s1 }
   0x7   :  { %v26_v4 = vsel %vm23_vm0, %v25_v3, 0.0  ;;  %s72_s2 = scalar_lea.vmem %s61_s1, 128  ;;  %p77_p1 = scmp.lt.s32.totalorder %s61_s1, %s61_s1 }
   0x8   :  { %v28_v5 = vsel %vm27_vm1, %v26_v4, 0.0  ;;  %vm36_vm2 = vcmp.lt.s32.totalorder %v33_v7, 2  ;;  %p73_p0 = scmp.ne.s32.totalorder %s61_s1, %s72_s2  ;;  %p78_p2 = scmp.lt.s32.totalorder %s72_s2, %s72_s2 }
   0x9   :  { %29 = vadd.xlane.f32.xlu0 %v28_v5 }
   0xa   :  { %p79_p3 = por %p78_p2, %p77_p1 }
   0xc   :  { %p80_p4 = pnand %p79_p3, %p73_p0 }
  0x96   :  { %v30_v9 = vpop.xlane.xlu0 %29 }
  0x97   :  { %v37_v10 = vmul.f32 %v30_v9, %v22_v8 }
  0x99   :  { %v38_v11 = vsel %vm36_vm2, %v37_v10, 0.0 }
  0x9a   :  { %v41_v12 = vsel %vm40_vm3, %v38_v11, 0.0 }
  0x9b   :  { %42 = vadd.xlane.f32.xlu0 %v41_v12 }
 0x128   :  { %v43_v13 = vpop.xlane.xlu0 %42 }
 0x129   :  { %v44_v14 = vrot.slane %v43_v13, 4 }
 0x12b   :  { %v45_v15 = vadd.f32 %v44_v14, %v43_v13 }
 0x12d   :  { %v46_v16 = vrot.slane %v45_v15, 2 }
 0x12f   :  { %v47_v17 = vadd.f32 %v46_v16, %v45_v15 }
 0x131   :  { %v48_v18 = vrot.slane %v47_v17, 1 }
 0x133   :  { %v49_v19 = vadd.f32 %v48_v18, %v47_v17 }
 0x135   :  { %68 = vpush %v49_v19 }
 0x166   :  { %s69_s18 = spop %68 }
 0x167   :  { %v51_v20 = vstv %s69_s18 }
 0x168   :  { %53 = vst [vmem:[#allocation2] sm:$0xff] %v51_v20 }
 0x169   :  { %83 = shalt.err (!%p80_p4)
}
 0x16a   :  { %s84_s21 = scalar_lea.hbm %s141_s3, 128 }
 0x16b   :  { %p85_p5 = scmp.ne.s32.totalorder %s141_s3, %s84_s21  ;;  %p88_p6 = scmp.lt.u32.totalorder %s84_s21, %s141_s3 }
 0x16d   :  { %p90_p7 = pnand %p88_p6, %p85_p5 }
 0x16f   :  { %93 = shalt.err (!%p90_p7)
}
 0x170   :  { %63 = dma.vmem_to_hbm [thread:$0]  %s61_s1, 128, %s141_s3, [#allocation3]  }
 0x171   :  { %94 = dma.done.wait [#allocation3], 128  }
 0x172   :  { %95 = vsyncadd [#allocation3], 4294967168 }
 0x173   :  { %67 = vsyncpa [#allocation3], 1 }

</bundles_post_ra>
